<compile_context>
chip_gen: v7x
topology: tpu7x:2x2x1
jax: 0.10.0
libtpu: 0.0.40
codegen_flags: <defaults>
</compile_context>

<pallas_src>
import jax
import jax.numpy as jnp
from jax import lax
from jax.experimental import pallas as pl
from jax.experimental.pallas import tpu as pltpu

_LANES = 128
_SUBLANES = 8


def _round_up(x, m):
    return ((x + m - 1) // m) * m


# --------------------------------------------------------------------------
# Phase 1: non-recurrent input projection  xproj = x @ W_x + b
# --------------------------------------------------------------------------
def _xproj_kernel(x_ref, wx_ref, b_ref, o_ref):
    o_ref[...] = (
        jnp.dot(x_ref[...], wx_ref[...], preferred_element_type=jnp.float32)
        + b_ref[...]
    )


def _input_projection(x_flat, w_x, b):
    """x_flat: (M, I) f32 -> (M, NF) f32, one large MXU matmul."""
    M, I = x_flat.shape
    NF = w_x.shape[1]
    if M <= 256:
        tm = _round_up(M, _SUBLANES)
    else:
        tm = 256
    M_pad = _round_up(M, tm)
    x_p = jnp.pad(x_flat, ((0, M_pad - M), (0, 0)))

    out = pl.pallas_call(
        _xproj_kernel,
        out_shape=jax.ShapeDtypeStruct((M_pad, NF), jnp.float32),
        grid=(M_pad // tm,),
        in_specs=[
            pl.BlockSpec((tm, I), lambda i: (i, 0)),   # x rows (streamed)
            pl.BlockSpec((I, NF), lambda i: (0, 0)),   # W_x (resident)
            pl.BlockSpec((1, NF), lambda i: (0, 0)),   # bias (resident)
        ],
        out_specs=pl.BlockSpec((tm, NF), lambda i: (i, 0)),
        compiler_params=pltpu.CompilerParams(
            dimension_semantics=("parallel",)),
    )(x_p, w_x, b)
    return out[:M]


# --------------------------------------------------------------------------
# Phase 2: recurrence  state_t = xproj_t + state_{t-1} @ W_h
# --------------------------------------------------------------------------
def _rnn_rec_kernel(xproj_ref, wh_ref, h0_ref, out_ref, state_ref):
    """One grid step = T_BLK timesteps.

    xproj_ref: (T_BLK, B_pad, NF)  precomputed x@W_x + b (streamed)
    wh_ref   : (NF, NF)            recurrent weight, rows >= H are zero (resident)
    h0_ref   : (B_pad, NF)         initial hidden embedded in fused layout (resident)
    out_ref  : (T_BLK, B_pad, NF)  cols [0:H)=new hidden, [H:H+O)=logits
    state_ref: (B_pad, NF)         VMEM scratch carrying state across grid steps
    """
    tb = pl.program_id(0)

    @pl.when(tb == 0)
    def _():
        state_ref[...] = h0_ref[...]

    wh = wh_ref[...]                       # hoisted; f32 or bf16
    t_blk = xproj_ref.shape[0]

    def step(s, carry):
        st = state_ref[...].astype(wh.dtype)
        new_state = xproj_ref[s] + jnp.dot(
            st, wh, preferred_element_type=jnp.float32)
        state_ref[...] = new_state
        out_ref[s] = new_state
        return carry

    lax.fori_loop(0, t_blk, step, 0, unroll=True)


def rnn_sequence_forward(x_seq, h0, params, *, t_block=8):
    """Run the RNN cell over a whole sequence.

    x_seq : (T, B, I) float32
    h0    : (B, H)    float32
    returns (outputs (T, B, O), hiddens (T, B, H))
    """
    w_x, w_h, b, H, O = params
    T, B, I = x_seq.shape
    NF = w_x.shape[1]
    B_pad = _round_up(B, _SUBLANES)

    # Phase 1: hoist the non-recurrent projection out of the serial loop.
    xproj = _input_projection(x_seq.reshape(T * B, I), w_x, b)      # (T*B, NF)
    xproj = xproj.reshape(T, B, NF)
    # Pad batch AFTER the bias add -> padded rows stay exactly zero forever.
    xproj = jnp.pad(xproj, ((0, 0), (0, B_pad - B), (0, 0)))

    t_blk = min(t_block, T)
    T_pad = _round_up(T, t_blk)
    if T_pad != T:
        xproj = jnp.pad(xproj, ((0, T_pad - T), (0, 0), (0, 0)))

    h0_p = jnp.zeros((B_pad, NF), jnp.float32).at[:B, :H].set(h0)

    # VMEM budget: W_h + h0 + state resident, xproj/out double-buffered.
    resident = NF * NF * w_h.dtype.itemsize + 2 * B_pad * NF * 4
    streamed = 2 * 2 * t_blk * B_pad * NF * 4
    needed = resident + streamed
    cp_kwargs = dict(dimension_semantics=("arbitrary",))  # recurrence: sequential
    if needed > 12 * 1024 * 1024:       # only raise the scoped limit when required
        cp_kwargs["vmem_limit_bytes"] = min(2 * needed, 64 * 1024 * 1024)

    fused = pl.pallas_call(
        _rnn_rec_kernel,
        out_shape=jax.ShapeDtypeStruct((T_pad, B_pad, NF), jnp.float32),
        grid=(T_pad // t_blk,),
        in_specs=[
            pl.BlockSpec((t_blk, B_pad, NF), lambda t: (t, 0, 0)),  # xproj (streamed)
            pl.BlockSpec((NF, NF), lambda t: (0, 0)),               # W_h (resident)
            pl.BlockSpec((B_pad, NF), lambda t: (0, 0)),            # h0  (resident)
        ],
        out_specs=pl.BlockSpec((t_blk, B_pad, NF), lambda t: (t, 0, 0)),
        scratch_shapes=[pltpu.VMEM((B_pad, NF), jnp.float32)],
        compiler_params=pltpu.CompilerParams(**cp_kwargs),
    )(xproj, w_h, h0_p)

    hiddens = fused[:T, :B, :H]
    outputs = fused[:T, :B, H:H + O]
    return outputs, hiddens


def rnn_forward(input_tensor, hidden, params):
    """Pallas equivalent of RNN.forward (single step, setup='BCEwithLL')."""
    outputs, hiddens = rnn_sequence_forward(input_tensor[None], hidden, params)
    # TODO(synk): setup='NLLoss' would apply LogSoftmax(dim=1) to `outputs` here.
    return outputs[0], hiddens[0]


# --------------------------------------------------------------------------
# Parameter helpers
# --------------------------------------------------------------------------
def init_params(key, input_size, hidden_size, output_size):
    """Mirror nn.Linear's U(-1/sqrt(fan_in), 1/sqrt(fan_in)) init, transposed."""
    fan_in = input_size + hidden_size
    bound = 1.0 / jnp.sqrt(jnp.float32(fan_in))
    k1, k2, k3, k4 = jax.random.split(key, 4)
    w_h_t = jax.random.uniform(k1, (fan_in, hidden_size), jnp.float32, -bound, bound)
    b_h = jax.random.uniform(k2, (1, hidden_size), jnp.float32, -bound, bound)
    w_o_t = jax.random.uniform(k3, (fan_in, output_size), jnp.float32, -bound, bound)
    b_o = jax.random.uniform(k4, (1, output_size), jnp.float32, -bound, bound)
    return w_h_t, b_h, w_o_t, b_o


def fuse_params(raw, input_size, hidden_size, output_size,
                recurrent_dtype=jnp.bfloat16):
    """Fuse i2h/i2o into one lane-padded weight pair (x-block, h-block) + bias.

    Columns [0:H) produce the new hidden, [H:H+O) the logits, rest are zero.
    Rows >= H of the h-block are zero so padded state columns never feed back.
    W_x / bias stay f32 (one exact batched matmul); W_h is cast to
    `recurrent_dtype` (bf16 default: native MXU dtype, half the VMEM residency).
    """
    w_h_t, b_h, w_o_t, b_o = raw
    I, H, O = input_size, hidden_size, output_size
    NF = max(_round_up(H + O, _LANES), _LANES)

    wxh, whh = w_h_t[:I], w_h_t[I:]        # (I, H), (H, H)
    wxo, who = w_o_t[:I], w_o_t[I:]        # (I, O), (H, O)

    w_x = jnp.zeros((I, NF), jnp.float32)
    w_x = w_x.at[:, :H].set(wxh).at[:, H:H + O].set(wxo)

    w_h = jnp.zeros((NF, NF), jnp.float32)
    w_h = w_h.at[:H, :H].set(whh).at[:H, H:H + O].set(who)
    w_h = w_h.astype(recurrent_dtype)

    b = jnp.zeros((1, NF), jnp.float32)
    b = b.at[:, :H].set(b_h).at[:, H:H + O].set(b_o)
    return (w_x, w_h, b, H, O)


# --------------------------------------------------------------------------
# References
# --------------------------------------------------------------------------
def _reference_f32(x_seq, h0, raw):
    """Pure-JAX replica of the original two-Linear PyTorch forward, per step."""
    w_h_t, b_h, w_o_t, b_o = raw
    outs, hids = [], []
    h = h0
    for t in range(x_seq.shape[0]):
        comb = jnp.concatenate([x_seq[t], h], axis=1)
        h = comb @ w_h_t + b_h
        o = comb @ w_o_t + b_o
        outs.append(o)
        hids.append(h)
    return jnp.stack(outs), jnp.stack(hids)


def _matched_recurrence_reference(x_seq, h0, params):
    """Dtype-matched replica of the recurrent phase (reuses the Pallas xproj so
    the check isolates the recurrence from XLA matmul-precision defaults)."""
    w_x, w_h, b, H, O = params
    T, B, I = x_seq.shape
    NF = w_x.shape[1]
    xproj = _input_projection(x_seq.reshape(T * B, I), w_x, b).reshape(T, B, NF)
    wh_f32 = w_h.astype(jnp.float32)
    state = jnp.zeros((B, NF), jnp.float32).at[:, :H].set(h0)
    outs, hids = [], []
    for t in range(T):
        st = state.astype(w_h.dtype).astype(jnp.float32)
        state = xproj[t] + jnp.dot(st, wh_f32, preferred_element_type=jnp.float32)
        outs.append(state[:, H:H + O])
        hids.append(state[:, :H])
    return jnp.stack(outs), jnp.stack(hids)


if __name__ == "__main__":
    input_size, hidden_size, output_size = 16, 32, 8
    batch, seq_len = 2, 8

    key = jax.random.PRNGKey(0)
    kp, kx = jax.random.split(key)
    raw = init_params(kp, input_size, hidden_size, output_size)

    x_seq = jax.random.normal(kx, (seq_len, batch, input_size), jnp.float32)
    h0 = jnp.zeros((batch, hidden_size), jnp.float32)   # init_hidden, per batch row

    # ---- f32 path: bit-comparable with the original two-Linear module -----
    params_f32 = fuse_params(raw, input_size, hidden_size, output_size,
                             recurrent_dtype=jnp.float32)

    out1, hid1 = rnn_forward(x_seq[0], h0, params_f32)   # single-step forward()
    jax.block_until_ready((out1, hid1))
    w_h_t, b_h, w_o_t, b_o = raw
    comb = jnp.concatenate([x_seq[0], h0], axis=1)
    assert out1.shape == (batch, output_size)
    assert hid1.shape == (batch, hidden_size)
    assert jnp.allclose(out1, comb @ w_o_t + b_o, atol=2e-4, rtol=1e-4)
    assert jnp.allclose(hid1, comb @ w_h_t + b_h, atol=2e-4, rtol=1e-4)

    outs, hids = rnn_sequence_forward(x_seq, h0, params_f32)
    jax.block_until_ready((outs, hids))
    ref_outs, ref_hids = _reference_f32(x_seq, h0, raw)
    assert outs.shape == (seq_len, batch, output_size)
    assert hids.shape == (seq_len, batch, hidden_size)
    assert jnp.allclose(outs, ref_outs, atol=5e-4, rtol=1e-4)
    assert jnp.allclose(hids, ref_hids, atol=5e-4, rtol=1e-4)

    # ---- bf16 recurrent-weight path (perf config) --------------------------
    params_bf16 = fuse_params(raw, input_size, hidden_size, output_size,
                              recurrent_dtype=jnp.bfloat16)
    outs_b, hids_b = rnn_sequence_forward(x_seq, h0, params_bf16)
    jax.block_until_ready((outs_b, hids_b))
    m_outs, m_hids = _matched_recurrence_reference(x_seq, h0, params_bf16)
    assert jnp.allclose(outs_b, m_outs, atol=1e-4, rtol=1e-4)
    assert jnp.allclose(hids_b, m_hids, atol=1e-4, rtol=1e-4)
    # Sanity vs the f32 module semantics (bf16 weight rounding ~1e-3 rel).
    assert jnp.allclose(outs_b, ref_outs, atol=3e-2, rtol=3e-2)
    assert jnp.allclose(hids_b, ref_hids, atol=3e-2, rtol=3e-2)

    # ---- longer sequence exercises the time-chunked grid (grid > 1 + pad) --
    long_T = 37
    x_long = jax.random.normal(jax.random.PRNGKey(1),
                               (long_T, batch, input_size), jnp.float32)
    outs_l, hids_l = rnn_sequence_forward(x_long, h0, params_f32, t_block=8)
    jax.block_until_ready((outs_l, hids_l))
    ref_outs_l, ref_hids_l = _reference_f32(x_long, h0, raw)
    assert jnp.allclose(outs_l, ref_outs_l, atol=5e-4, rtol=1e-4)
    assert jnp.allclose(hids_l, ref_hids_l, atol=5e-4, rtol=1e-4)

    print("KERNEL_OK")
</pallas_src>

<mosaic_0001>
module attributes {stable_mosaic.version = 11 : i64} {
  func.func @_xproj_kernel(%arg0: i32, %arg1: memref<8x16xf32, #tpu.memory_space<vmem>>, %arg2: memref<16x128xf32, #tpu.memory_space<vmem>>, %arg3: memref<1x128xf32, #tpu.memory_space<vmem>>, %arg4: memref<8x128xf32, #tpu.memory_space<vmem>>) attributes {dimension_semantics = [#tpu.dimension_semantics<parallel>], iteration_bounds = array<i64: 1>, scalar_prefetch = 0 : i64, scratch_operands = 0 : i64, tpu.core_type = #tpu.core_type<tc>, window_params = [{transform_indices = @transform_0, window_bounds = array<i64: 8, 16>}, {pipeline_mode = #tpu.pipeline_mode<synchronous>, transform_indices = @transform_1, window_bounds = array<i64: 16, 128>}, {pipeline_mode = #tpu.pipeline_mode<synchronous>, transform_indices = @transform_2, window_bounds = array<i64: 1, 128>}, {transform_indices = @transform_3, window_bounds = array<i64: 8, 128>}]} {
    %c0 = arith.constant 0 : index
    %c0_0 = arith.constant 0 : index
    %0 = vector.load %arg1[%c0, %c0_0] : memref<8x16xf32, #tpu.memory_space<vmem>>, vector<8x16xf32>
    %c0_1 = arith.constant 0 : index
    %c0_2 = arith.constant 0 : index
    %1 = vector.load %arg2[%c0_1, %c0_2] : memref<16x128xf32, #tpu.memory_space<vmem>>, vector<16x128xf32>
    %cst = arith.constant dense<0.000000e+00> : vector<8x128xf32>
    %2 = tpu.matmul %0, %1, %cst {dimension_numbers = #tpu.dot_dimension_numbers<[1], [0], [0], [1], [0, 0, 1, 1], [], []>} : vector<8x16xf32>, vector<16x128xf32>, vector<8x128xf32> -> vector<8x128xf32>
    %c0_3 = arith.constant 0 : index
    %c0_4 = arith.constant 0 : index
    %3 = vector.load %arg3[%c0_3, %c0_4] : memref<1x128xf32, #tpu.memory_space<vmem>>, vector<1x128xf32>
    %4 = vector.broadcast %3 : vector<1x128xf32> to vector<8x128xf32>
    %5 = arith.addf %2, %4 : vector<8x128xf32>
    %c0_5 = arith.constant 0 : index
    %c0_6 = arith.constant 0 : index
    %6 = vector.load %arg4[%c0_5, %c0_6] : memref<8x128xf32, #tpu.memory_space<vmem>>, vector<8x128xf32>
    tpu.vector_store %arg4[%c0_5, %c0_6], %5 {strides = array<i32>} : memref<8x128xf32, #tpu.memory_space<vmem>>, vector<8x128xf32>,
    return
  }
  func.func @transform_0(%arg0: i32) -> (i32, i32) {
    %c0_i32 = arith.constant 0 : i32
    %c0_i32_0 = arith.constant 0 : i32
    return %arg0, %c0_i32 : i32, i32
  }
  func.func @transform_1(%arg0: i32) -> (i32, i32) {
    %c0_i32 = arith.constant 0 : i32
    %c0_i32_0 = arith.constant 0 : i32
    %c0_i32_1 = arith.constant 0 : i32
    return %c0_i32, %c0_i32_0 : i32, i32
  }
  func.func @transform_2(%arg0: i32) -> (i32, i32) {
    %c0_i32 = arith.constant 0 : i32
    %c0_i32_0 = arith.constant 0 : i32
    %c0_i32_1 = arith.constant 0 : i32
    return %c0_i32, %c0_i32_0 : i32, i32
  }
  func.func @transform_3(%arg0: i32) -> (i32, i32) {
    %c0_i32 = arith.constant 0 : i32
    %c0_i32_0 = arith.constant 0 : i32
    return %arg0, %c0_i32 : i32, i32
  }
}

</mosaic_0001>

<bundles_post_ra>
// kernel: tpu_custom_call.1
= control target key start
LH: loop header
LB: loop body
LE: loop exit
PB: predicated region body
PF: predicated region fallthrough
CT: control target
= control target key end

     0   :  { %8 = vsyncpa [#allocation3], 0  ;;  %s311_s0 = inlined_call_operand.hbm [shape: f32[8,16], index: 0, kind: input, shape index: {}]   ;;  %s312_s1 = inlined_call_operand.hbm [shape: f32[16,128], index: 1, kind: input, shape index: {}]   ;;  %s313_s2 = inlined_call_operand.vmem [shape: f32[1,128], index: 2, kind: input, shape index: {}]   ;;  %s314_s3 = inlined_call_operand.hbm [shape: f32[8,128], index: 3, kind: output, shape index: {}]  }
   0x1   :  { %9 = vsyncpa [#allocation6], 0 }
   0x2   :  { %10 = vsyncpa [#allocation4], 0  ;;  %s237_s12 = smov [#allocation2]   ;;  %s238_s14 = smov [#allocation5]  }
   0x3   :  { %s17_s13 = sshll.u32 %s237_s12, 4  ;;  %s26_s15 = sshll.u32 %s238_s14, 4  ;;  %s18_s13 = int_to_ptr.vmem [resolvable:$true] %s17_s13  ;;  %s265_s15 = int_to_ptr.vmem [resolvable:$true] %s26_s15 }
   0x4   :  { %s165_s18 = scalar_lea.hbm %s311_s0, 128 }
   0x5   :  { %p166_p0 = scmp.ne.s32.totalorder %s311_s0, %s165_s18  ;;  %p169_p1 = scmp.lt.u32.totalorder %s165_s18, %s311_s0 }
   0x7   :  { %p171_p2 = pnand %p169_p1, %p166_p0 }
   0x9   :  { %174 = shalt.err (!%p171_p2)
}
   0xa   :  { %s175_s23 = scalar_lea.vmem %s18_s13, 128  ;;  %p180_p4 = scmp.lt.s32.totalorder %s18_s13, %s18_s13 }
   0xb   :  { %p176_p3 = scmp.ne.s32.totalorder %s18_s13, %s175_s23  ;;  %p181_p5 = scmp.lt.s32.totalorder %s175_s23, %s175_s23 }
   0xd   :  { %p182_p6 = por %p181_p5, %p180_p4 }
   0xf   :  { %p183_p7 = pnand %p182_p6, %p176_p3 }
  0x11   :  { %186 = shalt.err (!%p183_p7)
}
  0x12   :  { %20 = dma.hbm_to_vmem [thread:$0]  %s311_s0, 128, %s18_s13, [#allocation3]  }
  0x13   :  { %s187_s28 = scalar_lea.hbm %s312_s1, 256 }
  0x14   :  { %p188_p8 = scmp.ne.s32.totalorder %s312_s1, %s187_s28  ;;  %p191_p9 = scmp.lt.u32.totalorder %s187_s28, %s312_s1 }
  0x16   :  { %p193_p10 = pnand %p191_p9, %p188_p8 }
  0x18   :  { %196 = shalt.err (!%p193_p10)
}
  0x19   :  { %s197_s6 = scalar_lea.vmem %s265_s15, 256  ;;  %p202_p12 = scmp.lt.s32.totalorder %s265_s15, %s265_s15 }
  0x1a   :  { %p198_p11 = scmp.ne.s32.totalorder %s265_s15, %s197_s6  ;;  %p203_p13 = scmp.lt.s32.totalorder %s197_s6, %s197_s6 }
  0x1c   :  { %p204_p0 = por %p203_p13, %p202_p12 }
  0x1e   :  { %p205_p1 = pnand %p204_p0, %p198_p11 }
  0x20   :  { %208 = shalt.err (!%p205_p1)
}
  0x21   :  { %s239_s0 = smov 128   ;;  %s240_s7 = smov 8  }
  0x22   :  { %32 = dma.hbm_to_vmem [thread:$0]  %s312_s1, 256, %s265_s15, [#allocation6], %s239_s0, %s239_s0, %s240_s7  }
  0x23   :  { %231 = dma.done.wait [#allocation3], 128  }
  0x24   :  { %232 = vsyncadd [#allocation3], 4294967168 }
  0x25   :  { %233 = dma.done.wait [#allocation6], 256  }
  0x26   :  { %234 = vsyncadd [#allocation6], 4294967040  ;;  %v241_v0 = vmov 0.0|0.0   ;;  %vm242_vm0 = vmmov 0   ;;  %v243_v1 = vmov 0.0   ;;  %v42_v2 = vld [vmem:[#allocation5] sm:$0xff] }
  0x27   :  { %154 = vmatprep.subr.bf16.mxu0 %v241_v0  ;;  %151 = vmatprep.mubr.msk.f32.mxu0 %vm242_vm0, %v243_v1  ;;  %v43_v3 = vld [vmem:[#allocation5 + $0x8] sm:$0xff]  ;;  %v41_v5 = vld [vmem:[#allocation2] sm:$0xff]  ;;  %vm51_vm1 = vcmask 130048   ;;  %s244_s1 = smov [#allocation7]  }
  0x28   :  { %v155_v4 = vpack.c.bf16 %v43_v3, %v42_v2  ;;  %v142_v6 = vld [vmem:[%s313_s2] ss:$0 sm:$0xff]  ;;  %s132_s12 = sshll.u32 %s244_s1, 4  ;;  %s133_s12 = int_to_ptr.vmem [resolvable:$true] %s132_s12 }
  0x29   :  { %s209_s13 = scalar_lea.vmem %s133_s12, 128  ;;  %p214_p3 = scmp.lt.s32.totalorder %s133_s12, %s133_s12 }
  0x2a   :  { %156 = vmatpush3.bf16.msra.mxu0 %v155_v4  ;;  %p210_p2 = scmp.ne.s32.totalorder %s133_s12, %s209_s13  ;;  %p215_p4 = scmp.lt.s32.totalorder %s209_s13, %s209_s13 }
  0x2c   :  { %p216_p5 = por %p215_p4, %p214_p3 }
  0x2d   :  { %152 = vmatmul.mubr.msk.f32.vlgmr.msra.gmra.mrb[0].mxu0 %vm51_vm1, %v41_v5 }
  0x2e   :  { %p217_p6 = pnand %p216_p5, %p210_p2 }
 0x100   :  { %v121_v7 = vpop.f32.mrb[0].mxu0 }
 0x101   :  { %v122_v8 = vadd.f32 %v142_v6, %v121_v7  ;;  %v153_v9 = vpop.f32.mrb[1].mxu0 }
 0x103   :  { %125 = vst [vmem:[#allocation7] sm:$0xff] %v122_v8 }
 0x104   :  { %220 = shalt.err (!%p217_p6)
}
 0x105   :  { %s221_s16 = scalar_lea.hbm %s314_s3, 128 }
 0x106   :  { %p222_p7 = scmp.ne.s32.totalorder %s314_s3, %s221_s16  ;;  %p225_p8 = scmp.lt.u32.totalorder %s221_s16, %s314_s3 }
 0x108   :  { %p227_p9 = pnand %p225_p8, %p222_p7 }
 0x10a   :  { %230 = shalt.err (!%p227_p9)
}
 0x10b   :  { %135 = dma.vmem_to_hbm [thread:$0]  %s133_s12, 128, %s314_s3, [#allocation4]  }
 0x10c   :  { %235 = dma.done.wait [#allocation4], 128  }
 0x10d   :  { %236 = vsyncadd [#allocation4], 4294967168 }
 0x10e   :  { %139 = vsyncpa [#allocation3], 1 }
 0x10f   :  { %140 = vsyncpa [#allocation6], 1 }
 0x110   :  { %141 = vsyncpa [#allocation4], 1 }

</bundles_post_ra>
